<compile_context>
chip_gen: v7x
topology: tpu7x:2x2x1
jax: 0.10.0
libtpu: 0.0.40
codegen_flags: <defaults>
</compile_context>

<pallas_src>
import functools

import jax
import jax.numpy as jnp
from jax.experimental import pallas as pl
from jax.experimental.pallas import tpu as pltpu


def _linear_relu_kernel(x_ref, w_ref, b_ref, o_ref, acc_ref):
    # x_ref: (tm, tk)   w_ref: (tk, tn)   b_ref: (1, tn)
    # o_ref: (tm, tn)   acc_ref: (tm, tn) f32 scratch, resident across the k axis.
    k = pl.program_id(2)

    @pl.when(k == 0)
    def _():
        acc_ref[...] = jnp.zeros_like(acc_ref)

    # Weight already laid out (K, N): MXU-direct contraction, no transpose in-kernel.
    acc_ref[...] += jnp.dot(x_ref[...], w_ref[...],
                            preferred_element_type=jnp.float32)

    @pl.when(k == pl.num_programs(2) - 1)
    def _():
        # Epilogue on the VPU: bias add + ReLU, written exactly once to o_ref.
        y = acc_ref[...] + b_ref[...]
        o_ref[...] = jnp.maximum(y, 0.0).astype(o_ref.dtype)


def _round_up(v, m):
    return ((v + m - 1) // m) * m


@functools.partial(jax.jit, static_argnames=("tm", "tn", "tk"))
def logistic_forward(x, weight, bias, *, tm=256, tn=256, tk=256):
    """relu(x @ weight.T + bias) via a tiled Pallas TPU kernel.

    x:      (B, Fin)
    weight: (Fout, Fin)   (PyTorch nn.Linear convention)
    bias:   (Fout,)
    """
    B, Fin = x.shape
    Fout, _ = weight.shape

    # Transpose once at the XLA level (not inside the kernel).
    w_t = weight.T  # (Fin, Fout) == (K, N)

    # Clamp tiles to the padded problem size; keep lane dims 128-aligned,
    # sublane dims 8-aligned. (v5e-friendly 128 alignment; still MXU-aligned
    # multiples on v6e/v7x when the defaults of 256 apply.)
    tm = min(tm, _round_up(B, 8))
    tn = min(tn, _round_up(Fout, 128))
    tk = min(tk, _round_up(Fin, 128))

    M = _round_up(B, tm)
    N = _round_up(Fout, tn)
    K = _round_up(Fin, tk)

    # Zero-pad: padded K columns/rows contribute 0 to the dot, padded N columns get
    # relu(0 + 0) = 0 and are sliced off below, padded M rows are sliced off too.
    x_p = jnp.pad(x, ((0, M - B), (0, K - Fin)))
    w_p = jnp.pad(w_t, ((0, K - Fin), (0, N - Fout)))
    b_p = jnp.pad(bias, (0, N - Fout)).reshape(1, N)

    grid = (M // tm, N // tn, K // tk)

    out_padded = pl.pallas_call(
        _linear_relu_kernel,
        out_shape=jax.ShapeDtypeStruct((M, N), x.dtype),
        grid_spec=pltpu.PrefetchScalarGridSpec(
            num_scalar_prefetch=0,
            grid=grid,
            in_specs=[
                pl.BlockSpec((tm, tk), lambda i, j, k: (i, k)),   # x tile
                pl.BlockSpec((tk, tn), lambda i, j, k: (k, j)),   # w (K,N) tile
                pl.BlockSpec((1, tn), lambda i, j, k: (0, j)),    # bias tile
            ],
            out_specs=pl.BlockSpec((tm, tn), lambda i, j, k: (i, j)),
            scratch_shapes=[pltpu.VMEM((tm, tn), jnp.float32)],
        ),
        compiler_params=pltpu.CompilerParams(
            dimension_semantics=("parallel", "parallel", "arbitrary"),
            # Tiles at the default 256^3 f32 use ~2 MiB double-buffered, well inside
            # the 32 MiB scoped default on v6e/v7x and 16 MiB on v5e; raise this if
            # you grow the tiles.
            vmem_limit_bytes=32 * 1024 * 1024,
        ),
    )(x_p, w_p, b_p)

    return out_padded[:B, :Fout]


if __name__ == "__main__":
    key = jax.random.PRNGKey(0)
    k_x, k_w, k_b = jax.random.split(key, 3)

    batch = 8
    in_features = 32
    out_features = 16

    # Deterministic parameter init mimicking nn.Linear
    # (uniform in [-1/sqrt(fan_in), 1/sqrt(fan_in)]).
    bound = 1.0 / (in_features ** 0.5)
    weight = jax.random.uniform(
        k_w, (out_features, in_features), jnp.float32, minval=-bound, maxval=bound
    )
    bias = jax.random.uniform(
        k_b, (out_features,), jnp.float32, minval=-bound, maxval=bound
    )
    x = jax.random.normal(k_x, (batch, in_features), jnp.float32)

    out = logistic_forward(x, weight, bias)
    out = jax.block_until_ready(out)

    # Reference check in plain JAX (relu(x @ W^T + b), matching the module's forward).
    ref = jnp.maximum(x @ weight.T + bias, 0.0)
    assert out.shape == (batch, out_features)
    assert jnp.allclose(out, ref, atol=1e-5, rtol=1e-5)

    print("KERNEL_OK")
</pallas_src>

<mosaic_0001>
module attributes {stable_mosaic.version = 11 : i64} {
  func.func @_linear_relu_kernel(%arg0: i32, %arg1: i32, %arg2: i32, %arg3: memref<8x128xf32, #tpu.memory_space<vmem>>, %arg4: memref<128x128xf32, #tpu.memory_space<vmem>>, %arg5: memref<1x128xf32, #tpu.memory_space<vmem>>, %arg6: memref<8x128xf32, #tpu.memory_space<vmem>>, %arg7: memref<8x128xf32, #tpu.memory_space<vmem>>) attributes {dimension_semantics = [#tpu.dimension_semantics<parallel>, #tpu.dimension_semantics<parallel>, #tpu.dimension_semantics<arbitrary>], iteration_bounds = array<i64: 1, 1, 1>, scalar_prefetch = 0 : i64, scratch_operands = 1 : i64, tpu.core_type = #tpu.core_type<tc>, window_params = [{transform_indices = @transform_0, window_bounds = array<i64: 8, 128>}, {transform_indices = @transform_1, window_bounds = array<i64: 128, 128>}, {transform_indices = @transform_2, window_bounds = array<i64: 1, 128>}, {transform_indices = @transform_3, window_bounds = array<i64: 8, 128>}]} {
    %c0_i32 = arith.constant 0 : i32
    %0 = arith.cmpi eq, %arg2, %c0_i32 : i32
    %1 = arith.extui %0 : i1 to i32
    %c0_i32_0 = arith.constant 0 : i32
    %2 = arith.cmpi ne, %1, %c0_i32_0 : i32
    scf.if %2 {
      %cst_10 = arith.constant 0.000000e+00 : f32
      %12 = vector.broadcast %cst_10 : f32 to vector<8x128xf32>
      %c0_11 = arith.constant 0 : index
      %c0_12 = arith.constant 0 : index
      %13 = vector.load %arg7[%c0_11, %c0_12] : memref<8x128xf32, #tpu.memory_space<vmem>>, vector<8x128xf32>
      tpu.vector_store %arg7[%c0_11, %c0_12], %12 {strides = array<i32>} : memref<8x128xf32, #tpu.memory_space<vmem>>, vector<8x128xf32>,
    } else {
    }
    %c0 = arith.constant 0 : index
    %c0_1 = arith.constant 0 : index
    %3 = vector.load %arg7[%c0, %c0_1] : memref<8x128xf32, #tpu.memory_space<vmem>>, vector<8x128xf32>
    %c0_2 = arith.constant 0 : index
    %c0_3 = arith.constant 0 : index
    %4 = vector.load %arg3[%c0_2, %c0_3] : memref<8x128xf32, #tpu.memory_space<vmem>>, vector<8x128xf32>
    %c0_4 = arith.constant 0 : index
    %c0_5 = arith.constant 0 : index
    %5 = vector.load %arg4[%c0_4, %c0_5] : memref<128x128xf32, #tpu.memory_space<vmem>>, vector<128x128xf32>
    %cst = arith.constant dense<0.000000e+00> : vector<8x128xf32>
    %6 = tpu.matmul %4, %5, %cst {dimension_numbers = #tpu.dot_dimension_numbers<[1], [0], [0], [1], [0, 0, 1, 1], [], []>} : vector<8x128xf32>, vector<128x128xf32>, vector<8x128xf32> -> vector<8x128xf32>
    %7 = arith.addf %3, %6 : vector<8x128xf32>
    %c0_6 = arith.constant 0 : index
    %c0_7 = arith.constant 0 : index
    %8 = vector.load %arg7[%c0_6, %c0_7] : memref<8x128xf32, #tpu.memory_space<vmem>>, vector<8x128xf32>
    tpu.vector_store %arg7[%c0_6, %c0_7], %7 {strides = array<i32>} : memref<8x128xf32, #tpu.memory_space<vmem>>, vector<8x128xf32>,
    %c0_i32_8 = arith.constant 0 : i32
    %9 = arith.cmpi eq, %arg2, %c0_i32_8 : i32
    %10 = arith.extui %9 : i1 to i32
    %c0_i32_9 = arith.constant 0 : i32
    %11 = arith.cmpi ne, %10, %c0_i32_9 : i32
    scf.if %11 {
      %c0_10 = arith.constant 0 : index
      %c0_11 = arith.constant 0 : index
      %12 = vector.load %arg7[%c0_10, %c0_11] : memref<8x128xf32, #tpu.memory_space<vmem>>, vector<8x128xf32>
      %c0_12 = arith.constant 0 : index
      %c0_13 = arith.constant 0 : index
      %13 = vector.load %arg5[%c0_12, %c0_13] : memref<1x128xf32, #tpu.memory_space<vmem>>, vector<1x128xf32>
      %14 = vector.broadcast %13 : vector<1x128xf32> to vector<8x128xf32>
      %15 = arith.addf %12, %14 : vector<8x128xf32>
      %cst_14 = arith.constant 0.000000e+00 : f32
      %16 = vector.broadcast %cst_14 : f32 to vector<8x128xf32>
      %17 = arith.maximumf %15, %16 : vector<8x128xf32>
      %c0_15 = arith.constant 0 : index
      %c0_16 = arith.constant 0 : index
      %18 = vector.load %arg6[%c0_15, %c0_16] : memref<8x128xf32, #tpu.memory_space<vmem>>, vector<8x128xf32>
      tpu.vector_store %arg6[%c0_15, %c0_16], %17 {strides = array<i32>} : memref<8x128xf32, #tpu.memory_space<vmem>>, vector<8x128xf32>,
    } else {
    }
    return
  }
  func.func @transform_0(%arg0: i32, %arg1: i32, %arg2: i32) -> (i32, i32) {
    %c0_i32 = arith.constant 0 : i32
    return %arg0, %arg2 : i32, i32
  }
  func.func @transform_1(%arg0: i32, %arg1: i32, %arg2: i32) -> (i32, i32) {
    %c0_i32 = arith.constant 0 : i32
    return %arg2, %arg1 : i32, i32
  }
  func.func @transform_2(%arg0: i32, %arg1: i32, %arg2: i32) -> (i32, i32) {
    %c0_i32 = arith.constant 0 : i32
    %c0_i32_0 = arith.constant 0 : i32
    return %c0_i32, %arg1 : i32, i32
  }
  func.func @transform_3(%arg0: i32, %arg1: i32, %arg2: i32) -> (i32, i32) {
    %c0_i32 = arith.constant 0 : i32
    return %arg0, %arg1 : i32, i32
  }
}

</mosaic_0001>

<bundles_post_ra>
// kernel: logistic_forward.1
= control target key start
LH: loop header
LB: loop body
LE: loop exit
PB: predicated region body
PF: predicated region fallthrough
CT: control target
= control target key end

     0   :  { %v243_v3 = vmov 0.0|0.0   ;;  %vm244_vm0 = vmmov 0   ;;  %v245_v6 = vmov 0.0   ;;  %s333_s0 = inlined_call_operand.vmem [shape: f32[8,128], index: 0, kind: input, shape index: {}]   ;;  %s334_s1 = inlined_call_operand.vmem [shape: f32[128,128], index: 1, kind: input, shape index: {}]   ;;  %s335_s2 = inlined_call_operand.vmem [shape: f32[1,128], index: 2, kind: input, shape index: {}]   ;;  %s336_s3 = inlined_call_operand.hbm [shape: f32[8,128], index: 3, kind: output, shape index: {}]  }
   0x1   :  { %v22_v0 = vld [vmem:[%s334_s1] sm:$0xff]  ;;  %v23_v1 = vld [vmem:[%s334_s1 + $0x8] sm:$0xff]  ;;  %v24_v2 = vld [vmem:[%s334_s1 + $0x10] sm:$0xff]  ;;  %191 = vmatprep.subr.bf16.mxu0 %v243_v3  ;;  %188 = vmatprep.mubr.msk.f32.mxu0 %vm244_vm0, %v245_v6 }
   0x2   :  { %v192_v4 = vpack.c.bf16 %v23_v1, %v22_v0  ;;  %v25_v5 = vld [vmem:[%s334_s1 + $0x18] sm:$0xff]  ;;  %v26_v8 = vld [vmem:[%s334_s1 + $0x20] sm:$0xff]  ;;  %v27_v9 = vld [vmem:[%s334_s1 + $0x28] sm:$0xff] }
   0x3   :  { %v195_v7 = vpack.c.bf16 %v25_v5, %v24_v2 }
   0x4   :  { %193 = vmatpush3.bf16.msra.mxu0 %v192_v4 }
   0x5   :  { %194 = vmatprep.subr.bf16.mxu0 %v243_v3 }
   0x6   :  { %8 = vsyncpa [#allocation4], 0  ;;  %v198_v10 = vpack.c.bf16 %v27_v9, %v26_v8  ;;  %v28_v11 = vld [vmem:[%s334_s1 + $0x30] sm:$0xff]  ;;  %v29_v12 = vld [vmem:[%s334_s1 + $0x38] sm:$0xff]  ;;  %s246_s21 = smov [#allocation3]  }
   0x7   :  { %v201_v13 = vpack.c.bf16 %v29_v12, %v28_v11  ;;  %v30_v14 = vld [vmem:[%s334_s1 + $0x40] sm:$0xff]  ;;  %v31_v15 = vld [vmem:[%s334_s1 + $0x48] sm:$0xff]  ;;  %v32_v17 = vld [vmem:[%s334_s1 + $0x50] sm:$0xff]  ;;  %s130_s22 = sshll.u32 %s246_s21, 4  ;;  %s131_s22 = int_to_ptr.vmem [resolvable:$true] %s130_s22 }
   0x8   :  { %196 = vmatpush3.bf16.msra.mxu0 %v195_v7  ;;  %v204_v16 = vpack.c.bf16 %v31_v15, %v30_v14  ;;  %v33_v18 = vld [vmem:[%s334_s1 + $0x58] sm:$0xff]  ;;  %v34_v20 = vld [vmem:[%s334_s1 + $0x60] sm:$0xff]  ;;  %v35_v21 = vld [vmem:[%s334_s1 + $0x68] sm:$0xff]  ;;  %p224_p1 = scmp.lt.s32.totalorder %s131_s22, %s131_s22 }
   0x9   :  { %197 = vmatprep.subr.bf16.mxu0 %v243_v3  ;;  %v207_v19 = vpack.c.bf16 %v33_v18, %v32_v17  ;;  %v210_v22 = vpack.c.bf16 %v35_v21, %v34_v20  ;;  %v36_v23 = vld [vmem:[%s334_s1 + $0x70] sm:$0xff]  ;;  %v37_v24 = vld [vmem:[%s334_s1 + $0x78] sm:$0xff]  ;;  %v21_v26 = vld [vmem:[%s333_s0] sm:$0xff]  ;;  %s219_s1 = scalar_lea.vmem %s131_s22, 128 }
   0xa   :  { %v213_v25 = vpack.c.bf16 %v37_v24, %v36_v23  ;;  %v138_v27 = vld [vmem:[%s335_s2] ss:$0 sm:$0xff]  ;;  %p220_p0 = scmp.ne.s32.totalorder %s131_s22, %s219_s1  ;;  %p225_p2 = scmp.lt.s32.totalorder %s219_s1, %s219_s1 }
   0xc   :  { %199 = vmatpush3.bf16.msra.mxu0 %v198_v10  ;;  %p226_p3 = por %p225_p2, %p224_p1 }
   0xd   :  { %200 = vmatprep.subr.bf16.mxu0 %v243_v3 }
   0xe   :  { %p227_p4 = pnand %p226_p3, %p220_p0 }
  0x10   :  { %202 = vmatpush3.bf16.msra.mxu0 %v201_v13 }
  0x11   :  { %203 = vmatprep.subr.bf16.mxu0 %v243_v3 }
  0x14   :  { %205 = vmatpush3.bf16.msra.mxu0 %v204_v16 }
  0x15   :  { %206 = vmatprep.subr.bf16.mxu0 %v243_v3 }
  0x18   :  { %208 = vmatpush3.bf16.msra.mxu0 %v207_v19 }
  0x19   :  { %209 = vmatprep.subr.bf16.mxu0 %v243_v3 }
  0x1c   :  { %211 = vmatpush3.bf16.msra.mxu0 %v210_v22 }
  0x1d   :  { %212 = vmatprep.subr.bf16.mxu0 %v243_v3 }
  0x20   :  { %214 = vmatpush3.bf16.msra.mxu0 %v213_v25 }
  0x23   :  { %189 = vmatmul.mubr.f32.vlgmr.msra.gmra.mrb[0].mxu0 %v21_v26 }
  0xf6   :  { %v104_v28 = vpop.f32.mrb[0].mxu0 }
  0xf7   :  { %v121_v29 = vadd.f32 %v138_v27, %v104_v28  ;;  %v190_v30 = vpop.f32.mrb[1].mxu0 }
  0xf9   :  { %v122_v31 = vmax.f32 %v121_v29, 0.0 }
  0xfb   :  { %123 = vst [vmem:[#allocation3] sm:$0xff] %v122_v31 }
  0xfc   :  { %230 = shalt.err (!%p227_p4)
}
  0xfd   :  { %s231_s24 = scalar_lea.hbm %s336_s3, 128 }
  0xfe   :  { %p232_p5 = scmp.ne.s32.totalorder %s336_s3, %s231_s24  ;;  %p235_p6 = scmp.lt.u32.totalorder %s231_s24, %s336_s3 }
 0x100   :  { %p237_p7 = pnand %p235_p6, %p232_p5 }
 0x102   :  { %240 = shalt.err (!%p237_p7)
}
 0x103   :  { %133 = dma.vmem_to_hbm [thread:$0]  %s131_s22, 128, %s336_s3, [#allocation4]  }
 0x104   :  { %241 = dma.done.wait [#allocation4], 128  }
 0x105   :  { %242 = vsyncadd [#allocation4], 4294967168 }
 0x106   :  { %137 = vsyncpa [#allocation4], 1 }

</bundles_post_ra>
